<compile_context>
chip_gen: v7x
topology: tpu7x:2x2x1
jax: 0.10.0
libtpu: 0.0.40
codegen_flags: <defaults>
</compile_context>

<pallas_src>
import jax
import jax.numpy as jnp
from jax.experimental import pallas as pl
from jax.experimental.pallas import tpu as pltpu

_LANE = 128
_TARGET_TILE_BYTES = 2 * 1024 * 1024   # ~2 MiB per x tile -> ~85% HBM roofline
_SMALL_BYTES = 1 * 1024 * 1024         # below this: single block, single step
_VMEM_LIMIT = 32 * 1024 * 1024         # safe on v5e/v6e (128 MiB) and v7x (64 MiB)


def _round_up(v, m):
    return -(-v // m) * m


def _transf_kernel(x_ref, alpha_ref, beta_ref, o_ref):
    # x_ref/o_ref: (TB, TR, 128) or (TB, TF); alpha/beta: (1, TR, 128) or (1, TF).
    # The leading dim of alpha/beta is 1 and broadcasts over the batch tile.
    o_ref[...] = (x_ref[...] * alpha_ref[...] + beta_ref[...]).astype(o_ref.dtype)


def _affine_call(x_nd, a_nd, b_nd, x_block, ab_block, grid):
    # Grid ordering: feature tile OUTER, batch tile INNER.  alpha/beta block
    # indices are constant across the inner batch steps, so each feature tile
    # of the params is DMA'd once and stays VMEM-resident while all batch
    # tiles stream through.
    tail = (0,) * (len(x_block) - 2)
    return pl.pallas_call(
        _transf_kernel,
        out_shape=jax.ShapeDtypeStruct(x_nd.shape, x_nd.dtype),
        grid=grid,
        in_specs=[
            pl.BlockSpec(x_block, lambda r, b: (b, r) + tail),
            pl.BlockSpec(ab_block, lambda r, b: (0, r) + tail),
            pl.BlockSpec(ab_block, lambda r, b: (0, r) + tail),
        ],
        out_specs=pl.BlockSpec(x_block, lambda r, b: (b, r) + tail),
        compiler_params=pltpu.CompilerParams(
            dimension_semantics=("parallel", "parallel"),
            vmem_limit_bytes=_VMEM_LIMIT,
        ),
    )(x_nd, a_nd, b_nd)


def _forward_lane_aligned(x2, alpha, beta):
    """F % 128 == 0: lane-dense (B, R, 128) view, fully dense vregs/stores."""
    B, F = x2.shape
    R = F // _LANE
    item = x2.dtype.itemsize
    sub = max(8, 32 // item)            # packed sublane multiple (f32:8, bf16:16, i8:32)

    x3 = x2.reshape(B, R, _LANE)        # free reshapes of contiguous arrays
    a3 = alpha.reshape(1, R, _LANE)
    b3 = beta.reshape(1, R, _LANE)

    row_bytes = F * item
    total = B * row_bytes

    if total <= _SMALL_BYTES:
        # Tiny problem (demo case): one DMA in, one DMA out, no pipelining.
        TB, TR = B, R
    elif row_bytes >= _TARGET_TILE_BYTES:
        # One batch row already reaches the target: tile the feature axis,
        # keep TB = 1 so alpha/beta residency scales with the feature tile only.
        TR = min(R, max(sub, (_TARGET_TILE_BYTES // (_LANE * item)) // sub * sub))
        TB = 1
    else:
        # Whole feature axis resident; grow the BATCH tile to ~2 MiB.
        TR = R
        TB = min(B, -(-_TARGET_TILE_BYTES // row_bytes))

    # Guarantee >= 2 parallel blocks when there is enough work, so both v7x
    # TensorCores get fed (harmless on single-TC v5e/v6e).
    if total > _SMALL_BYTES and pl.cdiv(R, TR) * pl.cdiv(B, TB) < 2:
        if B >= 2:
            TB = -(-B // 2)
        elif R >= 2 * sub:
            TR = min(R, _round_up(-(-R // 2), sub))

    grid = (pl.cdiv(R, TR), pl.cdiv(B, TB))
    out3 = _affine_call(x3, a3, b3, (TB, TR, _LANE), (1, TR, _LANE), grid)
    return out3.reshape(B, F)


def _forward_ragged(x2, alpha, beta):
    """F % 128 != 0: tile the 2-D (B, F) array directly.  The ragged last
    feature block is masked by Pallas, so x is never padded in HBM and the
    output is never re-sliced (no extra HBM passes)."""
    B, F = x2.shape
    item = x2.dtype.itemsize
    sub = max(8, 32 // item)

    a2 = alpha.reshape(1, F)
    b2 = beta.reshape(1, F)

    row_bytes = F * item
    total = B * row_bytes

    if total <= _SMALL_BYTES:
        TB, TF = B, F                   # full-dim blocks: allowed even if F % 128 != 0
    elif sub * row_bytes >= _TARGET_TILE_BYTES:
        # Even one sublane group of rows reaches the target: tile features.
        # VMEM lays (TB, TF) out in (sub, 128) tiles, so budget with padded rows.
        TB = min(B, sub)
        TF = min(F, max(_LANE, (_TARGET_TILE_BYTES // (sub * item)) // _LANE * _LANE))
    else:
        TF = F
        TB = -(-_TARGET_TILE_BYTES // row_bytes)
        TB = B if TB >= B else min(B, _round_up(TB, sub))

    if total > _SMALL_BYTES and pl.cdiv(F, TF) * pl.cdiv(B, TB) < 2:
        tb_half = min(B, _round_up(-(-B // 2), sub))
        tf_half = _round_up(-(-F // 2), _LANE)
        if tb_half < B:
            TB = tb_half
        elif tf_half < F:
            TF = tf_half

    grid = (pl.cdiv(F, TF), pl.cdiv(B, TB))
    out2 = _affine_call(x2, a2, b2, (TB, TF), (1, TF), grid)
    return out2


def transf_forward(x, alpha, beta):
    """PrivFL Transf forward: x.view(B, -1) * alpha + beta (per-feature affine)."""
    B = x.shape[0]
    x2 = x.reshape(B, -1)               # torch .view(B, -1): free for contiguous x
    F = x2.shape[1]
    assert alpha.shape == (F,) and beta.shape == (F,)
    if F % _LANE == 0:
        return _forward_lane_aligned(x2, alpha, beta)
    return _forward_ragged(x2, alpha, beta)


if __name__ == "__main__":
    key = jax.random.PRNGKey(0)
    kx, ka, kb = jax.random.split(key, 3)

    # Small NCHW input; input_size (flattened feature count) = 4*16*16 = 1024.
    B, C, H, W = 2, 4, 16, 16
    F = C * H * W

    x = jax.random.normal(kx, (B, C, H, W), dtype=jnp.float32)
    # Deterministic params mimicking torch.rand(input_size) (uniform [0, 1)).
    alpha = jax.random.uniform(ka, (F,), dtype=jnp.float32)
    beta = jax.random.uniform(kb, (F,), dtype=jnp.float32)

    out = transf_forward(x, alpha, beta)
    out = jax.block_until_ready(out)

    # Reference check in plain JAX.
    ref = x.reshape(B, -1) * alpha + beta
    assert out.shape == (B, F)
    assert jnp.allclose(out, ref, atol=1e-6), "mismatch vs reference"

    print("KERNEL_OK")
</pallas_src>

<mosaic_0001>
module attributes {stable_mosaic.version = 11 : i64} {
  func.func @_transf_kernel(%arg0: i32, %arg1: i32, %arg2: memref<2x8x128xf32, #tpu.memory_space<vmem>>, %arg3: memref<1x8x128xf32, #tpu.memory_space<vmem>>, %arg4: memref<1x8x128xf32, #tpu.memory_space<vmem>>, %arg5: memref<2x8x128xf32, #tpu.memory_space<vmem>>) attributes {dimension_semantics = [#tpu.dimension_semantics<parallel>, #tpu.dimension_semantics<parallel>], iteration_bounds = array<i64: 1, 1>, scalar_prefetch = 0 : i64, scratch_operands = 0 : i64, tpu.core_type = #tpu.core_type<tc>, window_params = [{transform_indices = @transform_0, window_bounds = array<i64: 2, 8, 128>}, {transform_indices = @transform_1, window_bounds = array<i64: 1, 8, 128>}, {transform_indices = @transform_2, window_bounds = array<i64: 1, 8, 128>}, {transform_indices = @transform_3, window_bounds = array<i64: 2, 8, 128>}]} {
    %c0 = arith.constant 0 : index
    %c0_0 = arith.constant 0 : index
    %c0_1 = arith.constant 0 : index
    %0 = vector.load %arg2[%c0, %c0_0, %c0_1] : memref<2x8x128xf32, #tpu.memory_space<vmem>>, vector<2x8x128xf32>
    %c0_2 = arith.constant 0 : index
    %c0_3 = arith.constant 0 : index
    %c0_4 = arith.constant 0 : index
    %1 = vector.load %arg3[%c0_2, %c0_3, %c0_4] : memref<1x8x128xf32, #tpu.memory_space<vmem>>, vector<1x8x128xf32>
    %2 = vector.broadcast %1 : vector<1x8x128xf32> to vector<2x8x128xf32>
    %3 = arith.mulf %0, %2 : vector<2x8x128xf32>
    %c0_5 = arith.constant 0 : index
    %c0_6 = arith.constant 0 : index
    %c0_7 = arith.constant 0 : index
    %4 = vector.load %arg4[%c0_5, %c0_6, %c0_7] : memref<1x8x128xf32, #tpu.memory_space<vmem>>, vector<1x8x128xf32>
    %5 = vector.broadcast %4 : vector<1x8x128xf32> to vector<2x8x128xf32>
    %6 = arith.addf %3, %5 : vector<2x8x128xf32>
    %c0_8 = arith.constant 0 : index
    %c0_9 = arith.constant 0 : index
    %c0_10 = arith.constant 0 : index
    %7 = vector.load %arg5[%c0_8, %c0_9, %c0_10] : memref<2x8x128xf32, #tpu.memory_space<vmem>>, vector<2x8x128xf32>
    tpu.vector_store %arg5[%c0_8, %c0_9, %c0_10], %6 {strides = array<i32>} : memref<2x8x128xf32, #tpu.memory_space<vmem>>, vector<2x8x128xf32>,
    return
  }
  func.func @transform_0(%arg0: i32, %arg1: i32) -> (i32, i32, i32) {
    %c0_i32 = arith.constant 0 : i32
    %c0_i32_0 = arith.constant 0 : i32
    return %arg1, %arg0, %c0_i32 : i32, i32, i32
  }
  func.func @transform_1(%arg0: i32, %arg1: i32) -> (i32, i32, i32) {
    %c0_i32 = arith.constant 0 : i32
    %c0_i32_0 = arith.constant 0 : i32
    %c0_i32_1 = arith.constant 0 : i32
    return %c0_i32, %arg0, %c0_i32_0 : i32, i32, i32
  }
  func.func @transform_2(%arg0: i32, %arg1: i32) -> (i32, i32, i32) {
    %c0_i32 = arith.constant 0 : i32
    %c0_i32_0 = arith.constant 0 : i32
    %c0_i32_1 = arith.constant 0 : i32
    return %c0_i32, %arg0, %c0_i32_0 : i32, i32, i32
  }
  func.func @transform_3(%arg0: i32, %arg1: i32) -> (i32, i32, i32) {
    %c0_i32 = arith.constant 0 : i32
    %c0_i32_0 = arith.constant 0 : i32
    return %arg1, %arg0, %c0_i32 : i32, i32, i32
  }
}

</mosaic_0001>

<bundles_post_ra>
// kernel: tpu_custom_call.1
= control target key start
LH: loop header
LB: loop body
LE: loop exit
PB: predicated region body
PF: predicated region fallthrough
CT: control target
= control target key end

     0   :  { %8 = vsyncpa [#allocation3], 0  ;;  %s267_s0 = inlined_call_operand.hbm [shape: f32[2,8,128], index: 0, kind: input, shape index: {}]   ;;  %s268_s1 = inlined_call_operand.hbm [shape: f32[1,8,128], index: 1, kind: input, shape index: {}]   ;;  %s269_s2 = inlined_call_operand.hbm [shape: f32[1,8,128], index: 2, kind: input, shape index: {}]   ;;  %s270_s3 = inlined_call_operand.hbm [shape: f32[2,8,128], index: 3, kind: output, shape index: {}]  }
   0x1   :  { %9 = vsyncpa [#allocation6], 0 }
   0x2   :  { %10 = vsyncpa [#allocation4], 0  ;;  %s180_s12 = smov [#allocation5]   ;;  %s181_s14 = smov [#allocation2]  }
   0x3   :  { %s29_s13 = sshll.u32 %s180_s12, 4  ;;  %s16_s15 = sshll.u32 %s181_s14, 4  ;;  %s30_s13 = int_to_ptr.vmem [resolvable:$true] %s29_s13  ;;  %s206_s15 = int_to_ptr.vmem [resolvable:$true] %s16_s15 }
   0x4   :  { %s86_s18 = scalar_lea.hbm %s268_s1, 128 }
   0x5   :  { %p87_p0 = scmp.ne.s32.totalorder %s268_s1, %s86_s18  ;;  %p90_p1 = scmp.lt.u32.totalorder %s86_s18, %s268_s1 }
   0x7   :  { %p92_p2 = pnand %p90_p1, %p87_p0 }
   0x9   :  { %95 = shalt.err (!%p92_p2)
}
   0xa   :  { %s96_s23 = scalar_lea.vmem %s30_s13, 128  ;;  %p101_p4 = scmp.lt.s32.totalorder %s30_s13, %s30_s13 }
   0xb   :  { %p97_p3 = scmp.ne.s32.totalorder %s30_s13, %s96_s23  ;;  %p102_p5 = scmp.lt.s32.totalorder %s96_s23, %s96_s23 }
   0xd   :  { %p103_p6 = por %p102_p5, %p101_p4 }
   0xf   :  { %p104_p7 = pnand %p103_p6, %p97_p3 }
  0x11   :  { %107 = shalt.err (!%p104_p7)
}
  0x12   :  { %32 = dma.hbm_to_vmem [thread:$0]  %s268_s1, 128, %s30_s13, [#allocation6]  }
  0x13   :  { %s108_s28 = scalar_lea.hbm %s267_s0, 256 }
  0x14   :  { %p109_p8 = scmp.ne.s32.totalorder %s267_s0, %s108_s28  ;;  %p112_p9 = scmp.lt.u32.totalorder %s108_s28, %s267_s0 }
  0x16   :  { %p114_p10 = pnand %p112_p9, %p109_p8 }
  0x18   :  { %117 = shalt.err (!%p114_p10)
}
  0x19   :  { %s118_s6 = scalar_lea.vmem %s206_s15, 256  ;;  %p123_p12 = scmp.lt.s32.totalorder %s206_s15, %s206_s15 }
  0x1a   :  { %p119_p11 = scmp.ne.s32.totalorder %s206_s15, %s118_s6  ;;  %p124_p13 = scmp.lt.s32.totalorder %s118_s6, %s118_s6 }
  0x1c   :  { %p125_p0 = por %p124_p13, %p123_p12 }
  0x1e   :  { %p126_p1 = pnand %p125_p0, %p119_p11 }
  0x20   :  { %129 = shalt.err (!%p126_p1)
}
  0x21   :  { %s182_s1 = smov 128   ;;  %s183_s7 = smov 8  }
  0x22   :  { %22 = dma.hbm_to_vmem [thread:$0]  %s267_s0, 256, %s206_s15, [#allocation3], %s182_s1, %s182_s1, %s183_s7  }
  0x23   :  { %s184_s10 = smov [#allocation7]   ;;  %s130_s14 = scalar_lea.hbm %s269_s2, 128 }
  0x24   :  { %s39_s11 = sshll.u32 %s184_s10, 4  ;;  %p131_p2 = scmp.ne.s32.totalorder %s269_s2, %s130_s14  ;;  %s40_s11 = int_to_ptr.vmem [resolvable:$true] %s39_s11 }
  0x25   :  { %p134_p3 = scmp.lt.u32.totalorder %s130_s14, %s269_s2 }
  0x27   :  { %p136_p4 = pnand %p134_p3, %p131_p2 }
  0x29   :  { %139 = shalt.err (!%p136_p4)
}
  0x2a   :  { %s140_s20 = scalar_lea.vmem %s40_s11, 128  ;;  %p145_p6 = scmp.lt.s32.totalorder %s40_s11, %s40_s11 }
  0x2b   :  { %p141_p5 = scmp.ne.s32.totalorder %s40_s11, %s140_s20  ;;  %p146_p7 = scmp.lt.s32.totalorder %s140_s20, %s140_s20 }
  0x2d   :  { %p147_p8 = por %p146_p7, %p145_p6 }
  0x2f   :  { %p148_p9 = pnand %p147_p8, %p141_p5 }
  0x31   :  { %151 = shalt.err (!%p148_p9)
}
  0x32   :  { %42 = dma.hbm_to_vmem [thread:$0]  %s269_s2, 128, %s40_s11, [#allocation6]  }
  0x33   :  { %174 = dma.done.wait [#allocation3], 256  }
  0x34   :  { %175 = vsyncadd [#allocation3], 4294967040 }
  0x35   :  { %176 = dma.done.wait [#allocation6], 256  }
  0x36   :  { %177 = vsyncadd [#allocation6], 4294967040  ;;  %v52_v0 = vld [vmem:[#allocation2] sm:$0xff]  ;;  %v54_v1 = vld [vmem:[#allocation5] sm:$0xff]  ;;  %s185_s21 = smov [#allocation8]  }
  0x37   :  { %v57_v2 = vld [vmem:[#allocation7] sm:$0xff]  ;;  %v55_v3 = vmul.f32 %v54_v1, %v52_v0  ;;  %v53_v4 = vld [vmem:[#allocation2 + $0x8] sm:$0xff]  ;;  %s67_s22 = sshll.u32 %s185_s21, 4  ;;  %s68_s22 = int_to_ptr.vmem [resolvable:$true] %s67_s22 }
  0x38   :  { %v56_v5 = vmul.f32 %v54_v1, %v53_v4  ;;  %s152_s23 = scalar_lea.vmem %s68_s22, 256  ;;  %p157_p11 = scmp.lt.s32.totalorder %s68_s22, %s68_s22 }
  0x39   :  { %v58_v6 = vadd.f32 %v57_v2, %v55_v3  ;;  %p153_p10 = scmp.ne.s32.totalorder %s68_s22, %s152_s23  ;;  %p158_p12 = scmp.lt.s32.totalorder %s152_s23, %s152_s23 }
  0x3a   :  { %v59_v7 = vadd.f32 %v57_v2, %v56_v5 }
  0x3b   :  { %60 = vst [vmem:[#allocation8] sm:$0xff] %v58_v6  ;;  %p159_p13 = por %p158_p12, %p157_p11 }
  0x3c   :  { %61 = vst [vmem:[#allocation8 + $0x8] sm:$0xff] %v59_v7 }
  0x3d   :  { %p160_p0 = pnand %p159_p13, %p153_p10 }
  0x3f   :  { %163 = shalt.err (!%p160_p0)
}
  0x40   :  { %s164_s25 = scalar_lea.hbm %s270_s3, 256 }
  0x41   :  { %p165_p1 = scmp.ne.s32.totalorder %s270_s3, %s164_s25  ;;  %p168_p2 = scmp.lt.u32.totalorder %s164_s25, %s270_s3 }
  0x43   :  { %p170_p3 = pnand %p168_p2, %p165_p1 }
  0x45   :  { %173 = shalt.err (!%p170_p3)
}
  0x46   :  { %73 = dma.vmem_to_hbm [thread:$0]  %s68_s22, 256, %s270_s3, [#allocation4], %s182_s1, %s182_s1, %s183_s7  }
  0x47   :  { %178 = dma.done.wait [#allocation4], 256  }
  0x48   :  { %179 = vsyncadd [#allocation4], 4294967040 }
  0x49   :  { %77 = vsyncpa [#allocation3], 1 }
  0x4a   :  { %78 = vsyncpa [#allocation6], 1 }
  0x4b   :  { %79 = vsyncpa [#allocation4], 1 }

</bundles_post_ra>
